<compile_context>
chip_gen: v5e
topology: v5e:2x2
jax: 0.10.0
libtpu: 0.0.40
codegen_flags: <defaults>
</compile_context>

<pallas_src>
import jax
import jax.numpy as jnp
from jax.experimental import pallas as pl
from jax.experimental.pallas import tpu as pltpu

_LANES = 1024                     # lane-dense: multiple of 128 -> unmasked vst
_TARGET_BLOCK_BYTES = 4 << 20     # ~4 MiB per buffer (sweet spot on all gens)
_VMEM_LIMIT_BYTES = 48 << 20      # 4 bufs x 4 MiB = 16 MiB used; 48 MiB < v7x 64 MiB
_MIN_PALLAS_BYTES = 1 << 20       # below ~1 MiB of data, plain XLA wins


def _add_one_kernel(x_ref, o_ref):
    # Elementwise hot path on the VPU: output = input + 1 (dtype-preserving).
    o_ref[...] = x_ref[...] + jnp.asarray(1, dtype=x_ref.dtype)


def _round_up(n, m):
    return ((n + m - 1) // m) * m


def _add_one_pallas_2d(x2d, block_rows):
    rows, cols = x2d.shape
    itemsize = jnp.dtype(x2d.dtype).itemsize
    grid = (pl.cdiv(rows, block_rows),)   # ragged last block is masked by Pallas
    return pl.pallas_call(
        _add_one_kernel,
        out_shape=jax.ShapeDtypeStruct(x2d.shape, x2d.dtype),
        grid_spec=pltpu.PrefetchScalarGridSpec(
            num_scalar_prefetch=0,
            grid=grid,
            in_specs=[pl.BlockSpec((block_rows, cols), lambda i: (i, 0))],
            out_specs=pl.BlockSpec((block_rows, cols), lambda i: (i, 0)),
        ),
        input_output_aliases={0: 0},
        cost_estimate=pl.CostEstimate(
            flops=rows * cols,
            transcendentals=0,
            bytes_accessed=2 * rows * cols * itemsize,
        ),
        compiler_params=pltpu.CompilerParams(
            dimension_semantics=("parallel",),
            vmem_limit_bytes=_VMEM_LIMIT_BYTES,
        ),
    )(x2d)


def mynn_forward(x, force_pallas=False):
    """Mynn.forward: output = input + 1. Shape- and dtype-preserving."""
    x = jnp.asarray(x)
    n = x.size
    itemsize = jnp.dtype(x.dtype).itemsize

    # Fast path: 0-d scalar (the module's actual call) or anything < ~1 MiB.
    if not force_pallas and n * itemsize < _MIN_PALLAS_BYTES:
        return x + jnp.asarray(1, dtype=x.dtype)

    # Sublane multiple: 8 for 32-bit, 16 for bf16/f16, 32 for int8/fp8.
    sublane = max(8, 32 // itemsize)
    rows = pl.cdiv(n, _LANES)

    # Byte-budget tile sizing (dtype-aware); ensure >= 2 grid steps when the
    # data allows so v7x's two TensorCores both get a block.
    target_rows = max(
        sublane, (_TARGET_BLOCK_BYTES // (_LANES * itemsize)) // sublane * sublane
    )
    if rows > target_rows:
        block_rows = target_rows
    elif rows >= 4 * sublane:
        block_rows = _round_up(pl.cdiv(rows, 2), sublane)
    else:
        block_rows = rows          # single block == full array dims (tiny forced path)

    # Pad only to the next multiple of _LANES (<= 1023 elements); skip entirely
    # when already lane-aligned (common NN-tensor case) -> no extra HBM passes.
    padded_n = rows * _LANES
    flat = x.reshape(-1)
    if padded_n != n:
        flat = jnp.pad(flat, (0, padded_n - n))
    x2d = flat.reshape(rows, _LANES)

    out2d = _add_one_pallas_2d(x2d, block_rows)

    if padded_n != n:
        return out2d.reshape(-1)[:n].reshape(x.shape)
    return out2d.reshape(x.shape)


if __name__ == "__main__":
    key = jax.random.PRNGKey(0)

    # 1) The module's actual usage: a 0-d scalar (fast path, no Pallas launch).
    x_scalar = jnp.float32(1.0)  # consistent with torch.tensor(1.0)
    y_scalar = mynn_forward(x_scalar)
    jax.block_until_ready(y_scalar)
    assert y_scalar.shape == x_scalar.shape
    assert y_scalar.dtype == x_scalar.dtype
    assert jnp.allclose(y_scalar, x_scalar + 1.0), (y_scalar,)

    # 2) Exercise the Pallas kernel on a small, lane-aligned array (no padding).
    x = jax.random.normal(key, (2, 4, 16, 16), dtype=jnp.float32)
    y = mynn_forward(x, force_pallas=True)
    jax.block_until_ready(y)
    assert y.shape == x.shape
    assert y.dtype == x.dtype
    assert jnp.allclose(y, x + 1.0)

    # 3) Exercise the ragged (pad + slice) Pallas path on an odd-sized input.
    x_odd = jax.random.normal(key, (5, 7, 9), dtype=jnp.float32)
    y_odd = mynn_forward(x_odd, force_pallas=True)
    jax.block_until_ready(y_odd)
    assert y_odd.shape == x_odd.shape
    assert y_odd.dtype == x_odd.dtype
    assert jnp.allclose(y_odd, x_odd + 1.0)

    print("KERNEL_OK")
</pallas_src>

<mosaic_0001>
module attributes {stable_mosaic.version = 11 : i64} {
  func.func @_add_one_kernel(%arg0: i32, %arg1: memref<2x1024xf32, #tpu.memory_space<vmem>>, %arg2: memref<2x1024xf32, #tpu.memory_space<vmem>>) attributes {dimension_semantics = [#tpu.dimension_semantics<parallel>], iteration_bounds = array<i64: 1>, scalar_prefetch = 0 : i64, scratch_operands = 0 : i64, tpu.core_type = #tpu.core_type<tc>, window_params = [{transform_indices = @transform_0, window_bounds = array<i64: 2, 1024>}, {transform_indices = @transform_1, window_bounds = array<i64: 2, 1024>}]} {
    %c0 = arith.constant 0 : index
    %c0_0 = arith.constant 0 : index
    %0 = vector.load %arg1[%c0, %c0_0] : memref<2x1024xf32, #tpu.memory_space<vmem>>, vector<2x1024xf32>
    %cst = arith.constant 1.000000e+00 : f32
    %1 = vector.broadcast %cst : f32 to vector<2x1024xf32>
    %2 = arith.addf %0, %1 : vector<2x1024xf32>
    %c0_1 = arith.constant 0 : index
    %c0_2 = arith.constant 0 : index
    %3 = vector.load %arg2[%c0_1, %c0_2] : memref<2x1024xf32, #tpu.memory_space<vmem>>, vector<2x1024xf32>
    tpu.vector_store %arg2[%c0_1, %c0_2], %2 {strides = array<i32>} : memref<2x1024xf32, #tpu.memory_space<vmem>>, vector<2x1024xf32>,
    return
  }
  func.func @transform_0(%arg0: i32) -> (i32, i32) {
    %c0_i32 = arith.constant 0 : i32
    %c0_i32_0 = arith.constant 0 : i32
    return %arg0, %c0_i32 : i32, i32
  }
  func.func @transform_1(%arg0: i32) -> (i32, i32) {
    %c0_i32 = arith.constant 0 : i32
    %c0_i32_0 = arith.constant 0 : i32
    return %arg0, %c0_i32 : i32, i32
  }
}

</mosaic_0001>

<bundles_post_ra>
// kernel: tpu_custom_call.1
= control target key start
LH: loop header
LB: loop body
LE: loop exit
PB: predicated region body
PF: predicated region fallthrough
CT: control target
= control target key end

     0   :  { %6 = vsyncpa [#allocation3], 0  ;;  %s118_s0 = inlined_call_operand.hbm [shape: f32[2,1024], index: 0, kind: input, shape index: {}, may-alias: {0,1}]   ;;  %s119_s1 = inlined_call_operand.hbm [shape: f32[2,1024], index: 1, kind: output, shape index: {}, may-alias: {0,1}]  }
   0x1   :  { %7 = vsyncpa [#allocation4], 0  ;;  %s13_s8 = sshll.u32 %s118_s0, 4  ;;  %s100_s9 = smov [#allocation2]   ;;  %s14_s8 = int_to_ptr.hbm [resolvable:$true] %s13_s8 }
   0x2   :  { %s15_s10 = sshll.u32 %s100_s9, 4  ;;  %s16_s10 = int_to_ptr.vmem [resolvable:$true] %s15_s10 }
   0x3   :  { %18 = dma.hbm_to_vmem [thread:$0]  %s14_s8, 256, %s16_s10, [#allocation3]  }
   0x4   :  { %96 = dma.done.wait [#allocation3], 256  }
   0x5   :  { %97 = vsyncadd [#allocation3], 4294967040  ;;  %s101_s11 = smov [#allocation5]   ;;  %s36_s15 = sshll.u32 %s119_s1, 4  ;;  %v23_v0 = vld [vmem:[#allocation2] sm:$0xff]  ;;  %v24_v1 = vld [vmem:[#allocation2 + $0x8] sm:$0xff]  ;;  %s37_s15 = int_to_ptr.hbm [resolvable:$true] %s36_s15 }
   0x6   :  { %s34_s12 = sshll.u32 %s101_s11, 4  ;;  %v25_v2 = vadd.f32 1.0, %v23_v0  ;;  %v26_v3 = vadd.f32 1.0, %v24_v1  ;;  %s35_s12 = int_to_ptr.vmem [resolvable:$true] %s34_s12 }
   0x8   :  { %27 = vst [vmem:[#allocation5] sm:$0xff] %v25_v2 }
   0x9   :  { %28 = vst [vmem:[#allocation5 + $0x8] sm:$0xff] %v26_v3 }
   0xa   :  { %39 = dma.vmem_to_hbm [thread:$0]  %s35_s12, 256, %s37_s15, [#allocation4]  }
   0xb   :  { %98 = dma.done.wait [#allocation4], 256  }
   0xc   :  { %99 = vsyncadd [#allocation4], 4294967040 }
   0xd   :  { %44 = vsyncpa [#allocation3], 1 }
   0xe   :  { %45 = vsyncpa [#allocation4], 1 }

</bundles_post_ra>
